<compile_context>
chip_gen: v6e
topology: v6e:2x2x1
jax: 0.10.0
libtpu: 0.0.40
codegen_flags: <defaults>
</compile_context>

<pallas_src>
import jax
import jax.numpy as jnp
from jax.experimental import pallas as pl
from jax.experimental.pallas import tpu as pltpu

_LANE = 128
_SUBLANE = 16                   # bf16-safe batch-tile multiple
_BM_CAP = 4096                  # max batch tile rows (2-4K is the sweet spot on v7x)
_TILE_VMEM_BUDGET = 44 << 20    # bytes for streaming tiles; safe on v7x's 64 MiB VMEM


def _round_up(n, m):
    return ((n + m - 1) // m) * m


def _mlp_kernel(x_ref, we_ref, be_ref, w1_ref, b1_ref, w2_ref, b2_ref,
                w3_ref, b3_ref, o_ref):
    """Fused encoder + 3-layer MLP for one (bm, F) batch tile.

    bf16 operands on the MXU, f32 accumulation; biases/ReLU applied on the f32
    accumulator; activations recast to bf16 between layers."""
    # bf16 cast happens here (not in the wrapper) so x travels HBM->VMEM once as f32.
    x = x_ref[...].astype(jnp.bfloat16)

    # autoencoder.encoder: Linear(F, in_size) + ReLU
    # TODO(synk): the real autoencoder.encoder architecture is unspecified in the
    # reference; a Linear+ReLU encoder is substituted.
    h = jnp.dot(x, we_ref[...], preferred_element_type=jnp.float32)
    h = jnp.maximum(h + be_ref[...], 0.0)

    # fc1 + ReLU (dropout == identity in eval)
    h = jnp.dot(h.astype(jnp.bfloat16), w1_ref[...], preferred_element_type=jnp.float32)
    h = jnp.maximum(h + b1_ref[...], 0.0)

    # fc2 + ReLU (dropout == identity in eval)
    h = jnp.dot(h.astype(jnp.bfloat16), w2_ref[...], preferred_element_type=jnp.float32)
    h = jnp.maximum(h + b2_ref[...], 0.0)

    # fc3 (no activation); lane-dense bf16 store (out_pad = 128)
    out = jnp.dot(h.astype(jnp.bfloat16), w3_ref[...], preferred_element_type=jnp.float32)
    o_ref[...] = (out + b3_ref[...]).astype(o_ref.dtype)


def prepare_params(params):
    """Pad/cast weights & biases ONCE (hoisted out of the per-call forward path).

    Weights -> bf16, lane-padded to multiples of 128; biases stay f32 (added to the
    f32 accumulator).  Zero padding keeps the math exact: padded x columns hit zero
    weight rows, padded bias entries are zero, padded output lanes are sliced off."""
    we, be, w1, b1, w2, b2, w3, b3 = params
    F, in_size = we.shape
    hidden = w1.shape[1]
    out_size = w3.shape[1]
    F_pad = _round_up(F, _LANE)
    in_pad = _round_up(in_size, _LANE)
    hid_pad = _round_up(hidden, _LANE)
    out_pad = _round_up(out_size, _LANE)

    def pad2(a, rows, cols, dtype):
        return jnp.pad(a, ((0, rows - a.shape[0]),
                           (0, cols - a.shape[1]))).astype(dtype)

    return {
        "we": pad2(we, F_pad, in_pad, jnp.bfloat16),
        "be": pad2(be, 1, in_pad, jnp.float32),
        "w1": pad2(w1, in_pad, hid_pad, jnp.bfloat16),
        "b1": pad2(b1, 1, hid_pad, jnp.float32),
        "w2": pad2(w2, hid_pad, hid_pad, jnp.bfloat16),
        "b2": pad2(b2, 1, hid_pad, jnp.float32),
        "w3": pad2(w3, hid_pad, out_pad, jnp.bfloat16),
        "b3": pad2(b3, 1, out_pad, jnp.float32),
        "F": F, "F_pad": F_pad, "out_size": out_size, "out_pad": out_pad,
    }


def _choose_bm(batch, per_row_bytes, block_b):
    """Adaptive batch tile: minimize padding waste, stay inside the VMEM budget,
    keep >=2 grid steps for large batches (v7x megacore)."""
    if block_b is not None:
        return max(_SUBLANE, _round_up(int(block_b), _SUBLANE))
    bm_max = (_TILE_VMEM_BUDGET // per_row_bytes) // _SUBLANE * _SUBLANE
    bm_max = max(_SUBLANE, min(_BM_CAP, bm_max))
    nsteps = -(-batch // bm_max)            # ceil
    if batch >= 256:
        nsteps = max(nsteps, 2)             # let both v7x TensorCores get work
    bm = _round_up(-(-batch // nsteps), _SUBLANE)
    return max(_SUBLANE, bm)


def encoder_net_forward(x_nchw, prep, *, block_b=None):
    """x_nchw: (B, C, H, W) float32.  prep: output of prepare_params.
    Returns (B, out_size) float32."""
    B = x_nchw.shape[0]
    x_flat = x_nchw.reshape(B, -1)          # nn.Flatten (row-major, as PyTorch)
    F = x_flat.shape[1]
    assert F == prep["F"], (F, prep["F"])

    F_pad, out_pad, out_size = prep["F_pad"], prep["out_pad"], prep["out_size"]
    x_itemsize = jnp.dtype(x_flat.dtype).itemsize

    # Per-row streaming bytes: double-buffered f32 x tile + double-buffered bf16 out tile.
    per_row = 2 * F_pad * x_itemsize + 2 * out_pad * 2
    bm = _choose_bm(B, per_row, block_b)
    B_pad = _round_up(B, bm)
    grid = (B_pad // bm,)

    # Pad x only when actually needed (no-op for aligned shapes); no dtype cast here.
    if (B_pad != B) or (F_pad != F):
        x_p = jnp.pad(x_flat, ((0, B_pad - B), (0, F_pad - F)))
    else:
        x_p = x_flat

    weights = (prep["we"], prep["be"], prep["w1"], prep["b1"],
               prep["w2"], prep["b2"], prep["w3"], prep["b3"])

    def resident(arr):
        shp = arr.shape
        # Constant block index across the grid -> a single buffer suffices.
        return pl.BlockSpec(shp, lambda i: (0,) * len(shp),
                            pipeline_mode=pl.Buffered(1))

    # Explicit VMEM budget from the actual dtypes/tiles, with headroom; capped at
    # 56 MiB so it is valid on every generation (v7x has 64 MiB per TC).
    x_tile_bytes = 2 * bm * F_pad * x_itemsize          # double-buffered f32 x
    o_tile_bytes = 2 * bm * out_pad * 2                 # double-buffered bf16 out
    w_bytes = sum(int(a.size) * jnp.dtype(a.dtype).itemsize for a in weights)
    needed = x_tile_bytes + o_tile_bytes + w_bytes
    vmem_limit = int(min(56 << 20, max(32 << 20, needed + (8 << 20))))

    out_padded = pl.pallas_call(
        _mlp_kernel,
        out_shape=jax.ShapeDtypeStruct((B_pad, out_pad), jnp.bfloat16),
        grid_spec=pltpu.PrefetchScalarGridSpec(
            num_scalar_prefetch=0,
            grid=grid,
            in_specs=[pl.BlockSpec((bm, F_pad), lambda i: (i, 0))]  # x, tiled over batch
                     + [resident(a) for a in weights],
            out_specs=pl.BlockSpec((bm, out_pad), lambda i: (i, 0)),
        ),
        compiler_params=pltpu.CompilerParams(
            dimension_semantics=("parallel",),
            vmem_limit_bytes=vmem_limit),
    )(x_p, *weights)

    return out_padded[:B, :out_size].astype(jnp.float32)


def init_params(key, flat_in, in_size, hidden_size, out_size):
    """PyTorch-style init: U(-1/sqrt(fan_in), 1/sqrt(fan_in)).

    Weights stored as (in, out) -- transposed relative to nn.Linear's (out, in) --
    so the kernel computes y = x @ W + b directly."""
    def linear(k, fan_in, fan_out):
        kw, kb = jax.random.split(k)
        bound = 1.0 / jnp.sqrt(jnp.float32(fan_in))
        w = jax.random.uniform(kw, (fan_in, fan_out), jnp.float32, -bound, bound)
        b = jax.random.uniform(kb, (1, fan_out), jnp.float32, -bound, bound)
        return w, b

    k_enc, k1, k2, k3 = jax.random.split(key, 4)
    we, be = linear(k_enc, flat_in, in_size)        # autoencoder.encoder
    w1, b1 = linear(k1, in_size, hidden_size)       # fc1
    w2, b2 = linear(k2, hidden_size, hidden_size)   # fc2
    w3, b3 = linear(k3, hidden_size, out_size)      # fc3
    return (we, be, w1, b1, w2, b2, w3, b3)


def reference_forward(x_nchw, params):
    """Pure-JAX reference mirroring the kernel numerics (bf16 operands, f32
    accumulation, bf16 output store)."""
    we, be, w1, b1, w2, b2, w3, b3 = params
    bf = lambda a: a.astype(jnp.bfloat16).astype(jnp.float32)
    x = bf(x_nchw.reshape(x_nchw.shape[0], -1))
    h = jnp.maximum(x @ bf(we) + be, 0.0)
    h = jnp.maximum(bf(h) @ bf(w1) + b1, 0.0)
    h = jnp.maximum(bf(h) @ bf(w2) + b2, 0.0)
    out = bf(h) @ bf(w3) + b3
    return bf(out)                                   # kernel stores bf16


if __name__ == "__main__":
    # Small shapes consistent with the module's forward:
    #   x: (B=2, C=4, H=16, W=16) -> flatten -> F = 1024
    #   autoencoder.encoder: 1024 -> in_size=64
    #   fc1: 64 -> 32, fc2: 32 -> 32, fc3: 32 -> 16
    B, C, H, W = 2, 4, 16, 16
    in_size, hidden_size, out_size = 64, 32, 16
    F = C * H * W

    key = jax.random.PRNGKey(0)
    k_x, k_p = jax.random.split(key)
    x = jax.random.normal(k_x, (B, C, H, W), jnp.float32)
    params = init_params(k_p, F, in_size, hidden_size, out_size)

    prep = prepare_params(params)            # padded bf16 weights, built once
    out = encoder_net_forward(x, prep)
    out = jax.block_until_ready(out)

    ref = reference_forward(x, params)
    assert out.shape == (B, out_size), out.shape
    max_err = float(jnp.max(jnp.abs(out - ref)))
    assert jnp.allclose(out, ref, atol=2e-3, rtol=2e-3), f"max abs err = {max_err}"

    print("KERNEL_OK")
</pallas_src>

<mosaic_0001>
module attributes {stable_mosaic.version = 11 : i64} {
  func.func @_mlp_kernel(%arg0: i32, %arg1: memref<16x1024xf32, #tpu.memory_space<vmem>>, %arg2: memref<1024x128xbf16, #tpu.memory_space<vmem>>, %arg3: memref<1x128xf32, #tpu.memory_space<vmem>>, %arg4: memref<128x128xbf16, #tpu.memory_space<vmem>>, %arg5: memref<1x128xf32, #tpu.memory_space<vmem>>, %arg6: memref<128x128xbf16, #tpu.memory_space<vmem>>, %arg7: memref<1x128xf32, #tpu.memory_space<vmem>>, %arg8: memref<128x128xbf16, #tpu.memory_space<vmem>>, %arg9: memref<1x128xf32, #tpu.memory_space<vmem>>, %arg10: memref<16x128xbf16, #tpu.memory_space<vmem>>) attributes {dimension_semantics = [#tpu.dimension_semantics<parallel>], iteration_bounds = array<i64: 1>, scalar_prefetch = 0 : i64, scratch_operands = 0 : i64, tpu.core_type = #tpu.core_type<tc>, window_params = [{transform_indices = @transform_0, window_bounds = array<i64: 16, 1024>}, {pipeline_mode = #tpu.pipeline_mode<synchronous>, transform_indices = @transform_1, window_bounds = array<i64: 1024, 128>}, {pipeline_mode = #tpu.pipeline_mode<synchronous>, transform_indices = @transform_2, window_bounds = array<i64: 1, 128>}, {pipeline_mode = #tpu.pipeline_mode<synchronous>, transform_indices = @transform_3, window_bounds = array<i64: 128, 128>}, {pipeline_mode = #tpu.pipeline_mode<synchronous>, transform_indices = @transform_4, window_bounds = array<i64: 1, 128>}, {pipeline_mode = #tpu.pipeline_mode<synchronous>, transform_indices = @transform_5, window_bounds = array<i64: 128, 128>}, {pipeline_mode = #tpu.pipeline_mode<synchronous>, transform_indices = @transform_6, window_bounds = array<i64: 1, 128>}, {pipeline_mode = #tpu.pipeline_mode<synchronous>, transform_indices = @transform_7, window_bounds = array<i64: 128, 128>}, {pipeline_mode = #tpu.pipeline_mode<synchronous>, transform_indices = @transform_8, window_bounds = array<i64: 1, 128>}, {transform_indices = @transform_9, window_bounds = array<i64: 16, 128>}]} {
    %c0 = arith.constant 0 : index
    %c0_0 = arith.constant 0 : index
    %0 = vector.load %arg1[%c0, %c0_0] : memref<16x1024xf32, #tpu.memory_space<vmem>>, vector<16x1024xf32>
    %1 = arith.truncf %0 : vector<16x1024xf32> to vector<16x1024xbf16>
    %c0_1 = arith.constant 0 : index
    %c0_2 = arith.constant 0 : index
    %2 = vector.load %arg2[%c0_1, %c0_2] : memref<1024x128xbf16, #tpu.memory_space<vmem>>, vector<1024x128xbf16>
    %cst = arith.constant dense<0.000000e+00> : vector<16x128xf32>
    %3 = tpu.matmul %1, %2, %cst {dimension_numbers = #tpu.dot_dimension_numbers<[1], [0], [0], [1], [0, 0, 1, 1], [], []>} : vector<16x1024xbf16>, vector<1024x128xbf16>, vector<16x128xf32> -> vector<16x128xf32>
    %c0_3 = arith.constant 0 : index
    %c0_4 = arith.constant 0 : index
    %4 = vector.load %arg3[%c0_3, %c0_4] : memref<1x128xf32, #tpu.memory_space<vmem>>, vector<1x128xf32>
    %5 = vector.broadcast %4 : vector<1x128xf32> to vector<16x128xf32>
    %6 = arith.addf %3, %5 : vector<16x128xf32>
    %cst_5 = arith.constant 0.000000e+00 : f32
    %7 = vector.broadcast %cst_5 : f32 to vector<16x128xf32>
    %8 = arith.maximumf %6, %7 : vector<16x128xf32>
    %9 = arith.truncf %8 : vector<16x128xf32> to vector<16x128xbf16>
    %c0_6 = arith.constant 0 : index
    %c0_7 = arith.constant 0 : index
    %10 = vector.load %arg4[%c0_6, %c0_7] : memref<128x128xbf16, #tpu.memory_space<vmem>>, vector<128x128xbf16>
    %cst_8 = arith.constant dense<0.000000e+00> : vector<16x128xf32>
    %11 = tpu.matmul %9, %10, %cst_8 {dimension_numbers = #tpu.dot_dimension_numbers<[1], [0], [0], [1], [0, 0, 1, 1], [], []>} : vector<16x128xbf16>, vector<128x128xbf16>, vector<16x128xf32> -> vector<16x128xf32>
    %c0_9 = arith.constant 0 : index
    %c0_10 = arith.constant 0 : index
    %12 = vector.load %arg5[%c0_9, %c0_10] : memref<1x128xf32, #tpu.memory_space<vmem>>, vector<1x128xf32>
    %13 = vector.broadcast %12 : vector<1x128xf32> to vector<16x128xf32>
    %14 = arith.addf %11, %13 : vector<16x128xf32>
    %cst_11 = arith.constant 0.000000e+00 : f32
    %15 = vector.broadcast %cst_11 : f32 to vector<16x128xf32>
    %16 = arith.maximumf %14, %15 : vector<16x128xf32>
    %17 = arith.truncf %16 : vector<16x128xf32> to vector<16x128xbf16>
    %c0_12 = arith.constant 0 : index
    %c0_13 = arith.constant 0 : index
    %18 = vector.load %arg6[%c0_12, %c0_13] : memref<128x128xbf16, #tpu.memory_space<vmem>>, vector<128x128xbf16>
    %cst_14 = arith.constant dense<0.000000e+00> : vector<16x128xf32>
    %19 = tpu.matmul %17, %18, %cst_14 {dimension_numbers = #tpu.dot_dimension_numbers<[1], [0], [0], [1], [0, 0, 1, 1], [], []>} : vector<16x128xbf16>, vector<128x128xbf16>, vector<16x128xf32> -> vector<16x128xf32>
    %c0_15 = arith.constant 0 : index
    %c0_16 = arith.constant 0 : index
    %20 = vector.load %arg7[%c0_15, %c0_16] : memref<1x128xf32, #tpu.memory_space<vmem>>, vector<1x128xf32>
    %21 = vector.broadcast %20 : vector<1x128xf32> to vector<16x128xf32>
    %22 = arith.addf %19, %21 : vector<16x128xf32>
    %cst_17 = arith.constant 0.000000e+00 : f32
    %23 = vector.broadcast %cst_17 : f32 to vector<16x128xf32>
    %24 = arith.maximumf %22, %23 : vector<16x128xf32>
    %25 = arith.truncf %24 : vector<16x128xf32> to vector<16x128xbf16>
    %c0_18 = arith.constant 0 : index
    %c0_19 = arith.constant 0 : index
    %26 = vector.load %arg8[%c0_18, %c0_19] : memref<128x128xbf16, #tpu.memory_space<vmem>>, vector<128x128xbf16>
    %cst_20 = arith.constant dense<0.000000e+00> : vector<16x128xf32>
    %27 = tpu.matmul %25, %26, %cst_20 {dimension_numbers = #tpu.dot_dimension_numbers<[1], [0], [0], [1], [0, 0, 1, 1], [], []>} : vector<16x128xbf16>, vector<128x128xbf16>, vector<16x128xf32> -> vector<16x128xf32>
    %c0_21 = arith.constant 0 : index
    %c0_22 = arith.constant 0 : index
    %28 = vector.load %arg9[%c0_21, %c0_22] : memref<1x128xf32, #tpu.memory_space<vmem>>, vector<1x128xf32>
    %29 = vector.broadcast %28 : vector<1x128xf32> to vector<16x128xf32>
    %30 = arith.addf %27, %29 : vector<16x128xf32>
    %31 = arith.truncf %30 : vector<16x128xf32> to vector<16x128xbf16>
    %c0_23 = arith.constant 0 : index
    %c0_24 = arith.constant 0 : index
    %32 = vector.load %arg10[%c0_23, %c0_24] : memref<16x128xbf16, #tpu.memory_space<vmem>>, vector<16x128xbf16>
    tpu.vector_store %arg10[%c0_23, %c0_24], %31 {strides = array<i32>} : memref<16x128xbf16, #tpu.memory_space<vmem>>, vector<16x128xbf16>,
    return
  }
  func.func @transform_0(%arg0: i32) -> (i32, i32) {
    %c0_i32 = arith.constant 0 : i32
    %c0_i32_0 = arith.constant 0 : i32
    return %arg0, %c0_i32 : i32, i32
  }
  func.func @transform_1(%arg0: i32) -> (i32, i32) {
    %c0_i32 = arith.constant 0 : i32
    %c0_i32_0 = arith.constant 0 : i32
    %c0_i32_1 = arith.constant 0 : i32
    return %c0_i32, %c0_i32_0 : i32, i32
  }
  func.func @transform_2(%arg0: i32) -> (i32, i32) {
    %c0_i32 = arith.constant 0 : i32
    %c0_i32_0 = arith.constant 0 : i32
    %c0_i32_1 = arith.constant 0 : i32
    return %c0_i32, %c0_i32_0 : i32, i32
  }
  func.func @transform_3(%arg0: i32) -> (i32, i32) {
    %c0_i32 = arith.constant 0 : i32
    %c0_i32_0 = arith.constant 0 : i32
    %c0_i32_1 = arith.constant 0 : i32
    return %c0_i32, %c0_i32_0 : i32, i32
  }
  func.func @transform_4(%arg0: i32) -> (i32, i32) {
    %c0_i32 = arith.constant 0 : i32
    %c0_i32_0 = arith.constant 0 : i32
    %c0_i32_1 = arith.constant 0 : i32
    return %c0_i32, %c0_i32_0 : i32, i32
  }
  func.func @transform_5(%arg0: i32) -> (i32, i32) {
    %c0_i32 = arith.constant 0 : i32
    %c0_i32_0 = arith.constant 0 : i32
    %c0_i32_1 = arith.constant 0 : i32
    return %c0_i32, %c0_i32_0 : i32, i32
  }
  func.func @transform_6(%arg0: i32) -> (i32, i32) {
    %c0_i32 = arith.constant 0 : i32
    %c0_i32_0 = arith.constant 0 : i32
    %c0_i32_1 = arith.constant 0 : i32
    return %c0_i32, %c0_i32_0 : i32, i32
  }
  func.func @transform_7(%arg0: i32) -> (i32, i32) {
    %c0_i32 = arith.constant 0 : i32
    %c0_i32_0 = arith.constant 0 : i32
    %c0_i32_1 = arith.constant 0 : i32
    return %c0_i32, %c0_i32_0 : i32, i32
  }
  func.func @transform_8(%arg0: i32) -> (i32, i32) {
    %c0_i32 = arith.constant 0 : i32
    %c0_i32_0 = arith.constant 0 : i32
    %c0_i32_1 = arith.constant 0 : i32
    return %c0_i32, %c0_i32_0 : i32, i32
  }
  func.func @transform_9(%arg0: i32) -> (i32, i32) {
    %c0_i32 = arith.constant 0 : i32
    %c0_i32_0 = arith.constant 0 : i32
    return %arg0, %c0_i32 : i32, i32
  }
}

</mosaic_0001>

<bundles_post_ra>
// kernel: tpu_custom_call.1
= control target key start
LH: loop header
LB: loop body
LE: loop exit
PB: predicated region body
PF: predicated region fallthrough
CT: control target
= control target key end

     0   :  { %14 = vsyncpa [#allocation3], 0  ;;  %s1823_s0 = inlined_call_operand.hbm [shape: f32[16,1024], index: 0, kind: input, shape index: {}]   ;;  %s1824_s1 = inlined_call_operand.hbm [shape: bf16[1024,128], index: 1, kind: input, shape index: {}]   ;;  %s1825_s2 = inlined_call_operand.vmem [shape: f32[1,128], index: 2, kind: input, shape index: {}]   ;;  %s1826_s3 = inlined_call_operand.hbm [shape: bf16[128,128], index: 3, kind: input, shape index: {}]   ;;  %s1827_s4 = inlined_call_operand.vmem [shape: f32[1,128], index: 4, kind: input, shape index: {}]   ;;  %s1828_s5 = inlined_call_operand.hbm [shape: bf16[128,128], index: 5, kind: input, shape index: {}]   ;;  %s1829_s6 = inlined_call_operand.vmem [shape: f32[1,128], index: 6, kind: input, shape index: {}]   ;;  %s1830_s7 = inlined_call_operand.hbm [shape: bf16[128,128], index: 7, kind: input, shape index: {}]   ;;  %s1831_s8 = inlined_call_operand.vmem [shape: f32[1,128], index: 8, kind: input, shape index: {}]   ;;  %s1832_s9 = inlined_call_operand.hbm [shape: bf16[16,128], index: 9, kind: output, shape index: {}]  }
   0x1   :  { %15 = vsyncpa [#allocation6], 0 }
   0x2   :  { %16 = vsyncpa [#allocation9], 0 }
   0x3   :  { %17 = vsyncpa [#allocation4], 0  ;;  %s1686_s30 = smov [#allocation5]  }
   0x4   :  { %s35_s10 = sshll.u32 %s1686_s30, 4  ;;  %s36_s10 = int_to_ptr.vmem [resolvable:$true] %s35_s10 }
   0x5   :  { %s1566_s11 = scalar_lea.vmem %s36_s10, 8192  ;;  %p1571_p1 = scmp.lt.s32.totalorder %s36_s10, %s36_s10 }
   0x6   :  { %p1567_p0 = scmp.ne.s32.totalorder %s36_s10, %s1566_s11  ;;  %p1572_p2 = scmp.lt.s32.totalorder %s1566_s11, %s1566_s11 }
   0x8   :  { %p1573_p3 = por %p1572_p2, %p1571_p1 }
   0xa   :  { %p1574_p4 = pnand %p1573_p3, %p1567_p0 }
   0xc   :  { %1577 = shalt.err (!%p1574_p4)
}
   0xd   :  { %s1687_s12 = smov 64   ;;  %s1688_s13 = smov 4  }
   0xe   :  { %41 = dma.hbm_to_vmem [thread:$0]  %s1824_s1, 8192, %s36_s10, [#allocation6], %s1687_s12, %s1687_s12, %s1688_s13  }
   0xf   :  { %s1689_s16 = smov [#allocation8]   ;;  %s1690_s18 = smov [#allocation2]  }
  0x10   :  { %s63_s17 = sshll.u32 %s1689_s16, 4  ;;  %s23_s19 = sshll.u32 %s1690_s18, 4  ;;  %s64_s17 = int_to_ptr.vmem [resolvable:$true] %s63_s17  ;;  %s24_s19 = int_to_ptr.vmem [resolvable:$true] %s23_s19 }
  0x11   :  { %s1586_s20 = scalar_lea.vmem %s64_s17, 1024  ;;  %p1591_p6 = scmp.lt.s32.totalorder %s64_s17, %s64_s17 }
  0x12   :  { %p1587_p5 = scmp.ne.s32.totalorder %s64_s17, %s1586_s20  ;;  %p1592_p7 = scmp.lt.s32.totalorder %s1586_s20, %s1586_s20 }
  0x14   :  { %p1593_p8 = por %p1592_p7, %p1591_p6 }
  0x16   :  { %p1594_p9 = pnand %p1593_p8, %p1587_p5 }
  0x18   :  { %1597 = shalt.err (!%p1594_p9)
}
  0x19   :  { %69 = dma.hbm_to_vmem [thread:$0]  %s1828_s5, 1024, %s64_s17, [#allocation9], %s1687_s12, %s1687_s12, %s1688_s13  }
  0x1a   :  { %s1606_s1 = scalar_lea.vmem %s24_s19, 2048  ;;  %p1611_p11 = scmp.lt.s32.totalorder %s24_s19, %s24_s19 }
  0x1b   :  { %p1607_p10 = scmp.ne.s32.totalorder %s24_s19, %s1606_s1  ;;  %p1612_p12 = scmp.lt.s32.totalorder %s1606_s1, %s1606_s1 }
  0x1d   :  { %p1613_p13 = por %p1612_p12, %p1611_p11 }
  0x1f   :  { %p1614_p0 = pnand %p1613_p13, %p1607_p10 }
  0x21   :  { %1617 = shalt.err (!%p1614_p0)
}
  0x22   :  { %s1691_s23 = smov 1024   ;;  %s1692_s26 = smov [#allocation7]  }
  0x23   :  { %29 = dma.hbm_to_vmem [thread:$0]  %s1823_s0, 2048, %s24_s19, [#allocation3], %s1691_s23, %s1691_s23, %s1687_s12  }
  0x24   :  { %s49_s27 = sshll.u32 %s1692_s26, 4  ;;  %s1693_s28 = smov [#allocation10]   ;;  %s50_s27 = int_to_ptr.vmem [resolvable:$true] %s49_s27 }
  0x25   :  { %s77_s29 = sshll.u32 %s1693_s28, 4  ;;  %s1626_s5 = scalar_lea.vmem %s50_s27, 1024  ;;  %s78_s29 = int_to_ptr.vmem [resolvable:$true] %s77_s29 }
  0x26   :  { %p1627_p1 = scmp.ne.s32.totalorder %s50_s27, %s1626_s5  ;;  %p1631_p2 = scmp.lt.s32.totalorder %s50_s27, %s50_s27 }
  0x27   :  { %p1632_p3 = scmp.lt.s32.totalorder %s1626_s5, %s1626_s5 }
  0x29   :  { %p1633_p4 = por %p1632_p3, %p1631_p2 }
  0x2b   :  { %p1634_p5 = pnand %p1633_p4, %p1627_p1 }
  0x2d   :  { %1637 = shalt.err (!%p1634_p5)
}
  0x2e   :  { %55 = dma.hbm_to_vmem [thread:$0]  %s1826_s3, 1024, %s50_s27, [#allocation6], %s1687_s12, %s1687_s12, %s1688_s13  }
  0x2f   :  { %s1646_s0 = scalar_lea.vmem %s78_s29, 1024  ;;  %p1651_p7 = scmp.lt.s32.totalorder %s78_s29, %s78_s29 }
  0x30   :  { %p1647_p6 = scmp.ne.s32.totalorder %s78_s29, %s1646_s0  ;;  %p1652_p8 = scmp.lt.s32.totalorder %s1646_s0, %s1646_s0 }
  0x32   :  { %p1653_p9 = por %p1652_p8, %p1651_p7 }
  0x34   :  { %p1654_p10 = pnand %p1653_p9, %p1647_p6 }
  0x36   :  { %1657 = shalt.err (!%p1654_p10)
}
  0x37   :  { %83 = dma.hbm_to_vmem [thread:$0]  %s1830_s7, 1024, %s78_s29, [#allocation9], %s1687_s12, %s1687_s12, %s1688_s13  }
  0x38   :  { %1678 = dma.done.wait [#allocation3], 2048  }
  0x39   :  { %1679 = vsyncadd [#allocation3], 4294965248 }
  0x3a   :  { %1680 = dma.done.wait [#allocation6], 9216  }
  0x3b   :  { %1681 = vsyncadd [#allocation6], 4294958080 }
  0x3c   :  { %1682 = dma.done.wait [#allocation9], 2048  }
  0x3d   :  { %1683 = vsyncadd [#allocation9], 4294965248  ;;  %v1470_v0 = vld [vmem:[#allocation5 + $0x78] sm:$0xff]   ;;  %v1474_v4 = vld [vmem:[#allocation5 + $0x70] sm:$0xff]   ;;  %vm1695_vm0 = vmmov 0   ;;  %s1696_s19 = smov [#allocation11]  }
  0x3e   :  { %v1471_v1 = vld [vmem:[#allocation5 + $0xf8] sm:$0xff]   ;;  %1284 = vmatprep.subr.bf16.mxu0 %v1470_v0  ;;  %v1475_v5 = vld [vmem:[#allocation5 + $0xf0] sm:$0xff]   ;;  %v1478_v8 = vld [vmem:[#allocation5 + $0x68] sm:$0xff]   ;;  %s1169_s20 = sshll.u32 %s1696_s19, 4  ;;  %s1170_s20 = int_to_ptr.vmem [resolvable:$true] %s1169_s20 }
  0x3f   :  { %v1472_v2 = vld [vmem:[#allocation5 + $0x38] sm:$0xff]   ;;  %1306 = vmatprep.subr.bf16.mxu1 %v1471_v1  ;;  %v1476_v6 = vld [vmem:[#allocation5 + $0x30] sm:$0xff]   ;;  %v1479_v9 = vld [vmem:[#allocation5 + $0xe8] sm:$0xff]   ;;  %p1663_p12 = scmp.lt.s32.totalorder %s1170_s20, %s1170_s20 }
  0x40   :  { %v1473_v3 = vld [vmem:[#allocation5 + $0xb8] sm:$0xff]   ;;  %1285 = vmatpush3.bf16.msra.mxu0 %v1472_v2  ;;  %v1477_v7 = vld [vmem:[#allocation5 + $0xb0] sm:$0xff]   ;;  %v1480_v10 = vld [vmem:[#allocation5 + $0x28] sm:$0xff]  }
  0x41   :  { %1307 = vmatpush3.bf16.msra.mxu1 %v1473_v3  ;;  %1286 = vmatprep.subr.bf16.mxu0 %v1474_v4  ;;  %v1481_v11 = vld [vmem:[#allocation5 + $0xa8] sm:$0xff]   ;;  %v1482_v12 = vld [vmem:[#allocation5 + $0x60] sm:$0xff]   ;;  %v1486_v16 = vld [vmem:[#allocation5 + $0x58] sm:$0xff]  }
  0x42   :  { %1308 = vmatprep.subr.bf16.mxu1 %v1475_v5  ;;  %v1483_v13 = vld [vmem:[#allocation5 + $0xe0] sm:$0xff]   ;;  %v1487_v17 = vld [vmem:[#allocation5 + $0xd8] sm:$0xff]   ;;  %v1490_v20 = vld [vmem:[#allocation5 + $0x50] sm:$0xff]  }
  0x43   :  { %v1484_v14 = vld [vmem:[#allocation5 + $0x20] sm:$0xff]   ;;  %v1488_v18 = vld [vmem:[#allocation5 + $0x18] sm:$0xff]   ;;  %v1491_v21 = vld [vmem:[#allocation5 + $0xd0] sm:$0xff]  }
  0x44   :  { %1287 = vmatpush3.bf16.msra.mxu0 %v1476_v6  ;;  %v1485_v15 = vld [vmem:[#allocation5 + $0xa0] sm:$0xff]   ;;  %v1489_v19 = vld [vmem:[#allocation5 + $0x98] sm:$0xff]   ;;  %v1492_v22 = vld [vmem:[#allocation5 + $0x10] sm:$0xff]  }
  0x45   :  { %1309 = vmatpush3.bf16.msra.mxu1 %v1477_v7  ;;  %1288 = vmatprep.subr.bf16.mxu0 %v1478_v8  ;;  %v1493_v23 = vld [vmem:[#allocation5 + $0x90] sm:$0xff]   ;;  %v1494_v24 = vld [vmem:[#allocation5 + $0x48] sm:$0xff]   ;;  %v1498_v28 = vld [vmem:[#allocation5 + $0x40] sm:$0xff]  }
  0x46   :  { %1310 = vmatprep.subr.bf16.mxu1 %v1479_v9  ;;  %v1495_v25 = vld [vmem:[#allocation5 + $0xc8] sm:$0xff]   ;;  %v1499_v29 = vld [vmem:[#allocation5 + $0xc0] sm:$0xff]   ;;  %v105_v34 = vld [vmem:[#allocation2 + $0x18] sm:$0xff] }
  0x47   :  { %v1496_v26 = vld [vmem:[#allocation5 + $0x8] sm:$0xff]   ;;  %v1500_v30 = vld [vmem:[#allocation5] sm:$0xff]   ;;  %v113_v36 = vld [vmem:[#allocation2 + $0x58] sm:$0xff] }
  0x48   :  { %1289 = vmatpush3.bf16.msra.mxu0 %v1480_v10  ;;  %v1497_v27 = vld [vmem:[#allocation5 + $0x88] sm:$0xff]   ;;  %v1501_v31 = vld [vmem:[#allocation5 + $0x80] sm:$0xff]   ;;  %v121_v39 = vpack.c.bf16 %v113_v36, %v105_v34  ;;  %v104_v41 = vld [vmem:[#allocation2 + $0x10] sm:$0xff] }
  0x49   :  { %1311 = vmatpush3.bf16.msra.mxu1 %v1481_v11  ;;  %1290 = vmatprep.subr.bf16.mxu0 %v1482_v12  ;;  %v103_v32 = vld [vmem:[#allocation2 + $0x8] sm:$0xff]  ;;  %v102_v37 = vld [vmem:[#allocation2] sm:$0xff]  ;;  %v112_v42 = vld [vmem:[#allocation2 + $0x50] sm:$0xff] }
  0x4a   :  { %1312 = vmatprep.subr.bf16.mxu1 %v1483_v13  ;;  %v111_v33 = vld [vmem:[#allocation2 + $0x48] sm:$0xff]  ;;  %v110_v38 = vld [vmem:[#allocation2 + $0x40] sm:$0xff]  ;;  %v120_v43 = vpack.c.bf16 %v112_v42, %v104_v41  ;;  %v1502_v44 = vld [vmem:[#allocation5 + $0x178] sm:$0xff]   ;;  %718 = vmatprep.mubr.bf16.mxu1 %v121_v39 }
  0x4b   :  { %v119_v35 = vpack.c.bf16 %v111_v33, %v103_v32  ;;  %v118_v40 = vpack.c.bf16 %v110_v38, %v102_v37  ;;  %v1503_v45 = vld [vmem:[#allocation5 + $0x1f8] sm:$0xff]   ;;  %v1506_v48 = vld [vmem:[#allocation5 + $0x170] sm:$0xff]   ;;  %v1510_v52 = vld [vmem:[#allocation5 + $0x168] sm:$0xff]  }
  0x4c   :  { %1291 = vmatpush3.bf16.msra.mxu0 %v1484_v14  ;;  %v1504_v46 = vld [vmem:[#allocation5 + $0x138] sm:$0xff]   ;;  %v1507_v49 = vld [vmem:[#allocation5 + $0x1f0] sm:$0xff]   ;;  %v1511_v53 = vld [vmem:[#allocation5 + $0x1e8] sm:$0xff]  }
  0x4d   :  { %1313 = vmatpush3.bf16.msra.mxu1 %v1485_v15  ;;  %1292 = vmatprep.subr.bf16.mxu0 %v1486_v16  ;;  %v1505_v47 = vld [vmem:[#allocation5 + $0x1b8] sm:$0xff]   ;;  %v1508_v50 = vld [vmem:[#allocation5 + $0x130] sm:$0xff]   ;;  %v1512_v54 = vld [vmem:[#allocation5 + $0x128] sm:$0xff]  }
  0x4e   :  { %1314 = vmatprep.subr.bf16.mxu1 %v1487_v17  ;;  %677 = vmatprep.mubr.bf16.mxu0 %v119_v35  ;;  %v1509_v51 = vld [vmem:[#allocation5 + $0x1b0] sm:$0xff]   ;;  %v1513_v55 = vld [vmem:[#allocation5 + $0x1a8] sm:$0xff]   ;;  %v1514_v56 = vld [vmem:[#allocation5 + $0x160] sm:$0xff]  }
  0x4f   :  { %v1515_v57 = vld [vmem:[#allocation5 + $0x1e0] sm:$0xff]   ;;  %v1518_v60 = vld [vmem:[#allocation5 + $0x158] sm:$0xff]   ;;  %v1522_v0 = vld [vmem:[#allocation5 + $0x150] sm:$0xff]  }
  0x50   :  { %1293 = vmatpush3.bf16.msra.mxu0 %v1488_v18  ;;  %v1516_v58 = vld [vmem:[#allocation5 + $0x120] sm:$0xff]   ;;  %v1519_v61 = vld [vmem:[#allocation5 + $0x1d8] sm:$0xff]   ;;  %v1523_v1 = vld [vmem:[#allocation5 + $0x1d0] sm:$0xff]  }
  0x51   :  { %1315 = vmatpush3.bf16.msra.mxu1 %v1489_v19  ;;  %1294 = vmatprep.subr.bf16.mxu0 %v1490_v20  ;;  %v1517_v59 = vld [vmem:[#allocation5 + $0x1a0] sm:$0xff]   ;;  %v1520_v62 = vld [vmem:[#allocation5 + $0x118] sm:$0xff]   ;;  %v1524_v2 = vld [vmem:[#allocation5 + $0x110] sm:$0xff]  }
  0x52   :  { %1316 = vmatprep.subr.bf16.mxu1 %v1491_v21  ;;  %v1521_v63 = vld [vmem:[#allocation5 + $0x198] sm:$0xff]   ;;  %v1525_v3 = vld [vmem:[#allocation5 + $0x190] sm:$0xff]   ;;  %v1526_v4 = vld [vmem:[#allocation5 + $0x148] sm:$0xff]  }
  0x53   :  { %v1527_v5 = vld [vmem:[#allocation5 + $0x1c8] sm:$0xff]   ;;  %v1530_v8 = vld [vmem:[#allocation5 + $0x140] sm:$0xff]   ;;  %v109_v14 = vld [vmem:[#allocation2 + $0x38] sm:$0xff] }
  0x54   :  { %1295 = vmatpush3.bf16.msra.mxu0 %v1492_v22  ;;  %v1528_v6 = vld [vmem:[#allocation5 + $0x108] sm:$0xff]   ;;  %v1531_v9 = vld [vmem:[#allocation5 + $0x1c0] sm:$0xff]   ;;  %v117_v15 = vld [vmem:[#allocation2 + $0x78] sm:$0xff] }
  0x55   :  { %1317 = vmatpush3.bf16.msra.mxu1 %v1493_v23  ;;  %1296 = vmatprep.subr.bf16.mxu0 %v1494_v24  ;;  %v1529_v7 = vld [vmem:[#allocation5 + $0x188] sm:$0xff]   ;;  %v1532_v10 = vld [vmem:[#allocation5 + $0x100] sm:$0xff]   ;;  %v125_v17 = vpack.c.bf16 %v117_v15, %v109_v14  ;;  %v108_v20 = vld [vmem:[#allocation2 + $0x30] sm:$0xff] }
  0x56   :  { %1318 = vmatprep.subr.bf16.mxu1 %v1495_v25  ;;  %v1533_v11 = vld [vmem:[#allocation5 + $0x180] sm:$0xff]   ;;  %v107_v12 = vld [vmem:[#allocation2 + $0x28] sm:$0xff]  ;;  %v116_v22 = vld [vmem:[#allocation2 + $0x70] sm:$0xff]  ;;  %v1694_v25 = vmov 0.0  }
  0x57   :  { %v115_v13 = vld [vmem:[#allocation2 + $0x68] sm:$0xff]  ;;  %v106_v18 = vld [vmem:[#allocation2 + $0x20] sm:$0xff]  ;;  %v124_v23 = vpack.c.bf16 %v116_v22, %v108_v20  ;;  %v1534_v24 = vld [vmem:[#allocation7 + $0x38] sm:$0xff]  }
  0x58   :  { %1297 = vmatpush3.bf16.msra.mxu0 %v1496_v26  ;;  %v123_v16 = vpack.c.bf16 %v115_v13, %v107_v12  ;;  %v114_v19 = vld [vmem:[#allocation2 + $0x60] sm:$0xff]  ;;  %v1535_v26 = vld [vmem:[#allocation7 + $0x30] sm:$0xff]   ;;  %v1542_v33 = vld [vmem:[#allocation8 + $0x38] sm:$0xff]  }
  0x59   :  { %1319 = vmatpush3.bf16.msra.mxu1 %v1497_v27  ;;  %1298 = vmatprep.subr.bf16.mxu0 %v1498_v28  ;;  %v122_v21 = vpack.c.bf16 %v114_v19, %v106_v18  ;;  %v1536_v27 = vld [vmem:[#allocation7 + $0x28] sm:$0xff]   ;;  %v1537_v28 = vld [vmem:[#allocation7 + $0x20] sm:$0xff]   ;;  %v1543_v34 = vld [vmem:[#allocation8 + $0x30] sm:$0xff]  }
  0x5a   :  { %1320 = vmatprep.subr.bf16.mxu1 %v1499_v29  ;;  %v1538_v29 = vld [vmem:[#allocation7 + $0x18] sm:$0xff]   ;;  %v1541_v32 = vld [vmem:[#allocation7] sm:$0xff]   ;;  %v1544_v35 = vld [vmem:[#allocation8 + $0x28] sm:$0xff]  }
  0x5b   :  { %v1545_v36 = vld [vmem:[#allocation8 + $0x20] sm:$0xff]   ;;  %v1546_v37 = vld [vmem:[#allocation8 + $0x18] sm:$0xff]   ;;  %v1551_v14 = vld [vmem:[#allocation10 + $0x30] sm:$0xff]  }
  0x5c   :  { %1299 = vmatpush3.bf16.msra.mxu0 %v1500_v30  ;;  %v1539_v30 = vld [vmem:[#allocation7 + $0x10] sm:$0xff]   ;;  %v1549_v12 = vld [vmem:[#allocation8] sm:$0xff]   ;;  %v1550_v13 = vld [vmem:[#allocation10 + $0x38] sm:$0xff]  }
  0x5d   :  { %1321 = vmatpush3.bf16.msra.mxu1 %v1501_v31  ;;  %1328 = vmatprep.subr.bf16.mxu0 %v1502_v44  ;;  %v1540_v31 = vld [vmem:[#allocation7 + $0x8] sm:$0xff]   ;;  %v1248_v18 = vld [vmem:[%s1827_s4] ss:$0 sm:$0xff] }
  0x5e   :  { %1350 = vmatprep.subr.bf16.mxu1 %v1503_v45  ;;  %v1183_v45 = vld [vmem:[%s1825_s2] ss:$0 sm:$0xff]  ;;  %v1552_v15 = vld [vmem:[#allocation10 + $0x28] sm:$0xff]  }
  0x5f   :  { %678 = vmatmul.mubr.bf16.vlgmr.msra.gmra.mxu0 %v118_v40 }
  0x60   :  { %719 = vmatmul.mubr.bf16.vlgmr.msra.gmra.mxu1 %v120_v43  ;;  %1329 = vmatpush3.bf16.msra.mxu0 %v1504_v46 }
  0x61   :  { %1351 = vmatpush3.bf16.msra.mxu1 %v1505_v47  ;;  %1330 = vmatprep.subr.bf16.mxu0 %v1506_v48 }
  0x62   :  { %1352 = vmatprep.subr.bf16.mxu1 %v1507_v49  ;;  %759 = vmatprep.mubr.bf16.mxu0 %v123_v16  ;;  %v1553_v16 = vld [vmem:[#allocation10 + $0x20] sm:$0xff]  }
  0x63   :  { %800 = vmatprep.mubr.bf16.mxu1 %v125_v17  ;;  %v1554_v17 = vld [vmem:[#allocation10 + $0x18] sm:$0xff]  }
  0x64   :  { %1331 = vmatpush3.bf16.msra.mxu0 %v1508_v50 }
  0x65   :  { %1353 = vmatpush3.bf16.msra.mxu1 %v1509_v51  ;;  %1332 = vmatprep.subr.bf16.mxu0 %v1510_v52 }
  0x66   :  { %1354 = vmatprep.subr.bf16.mxu1 %v1511_v53 }
  0x68   :  { %1333 = vmatpush3.bf16.msra.mxu0 %v1512_v54 }
  0x69   :  { %1355 = vmatpush3.bf16.msra.mxu1 %v1513_v55  ;;  %1334 = vmatprep.subr.bf16.mxu0 %v1514_v56 }
  0x6a   :  { %1356 = vmatprep.subr.bf16.mxu1 %v1515_v57 }
  0x6c   :  { %1335 = vmatpush3.bf16.msra.mxu0 %v1516_v58 }
  0x6d   :  { %1357 = vmatpush3.bf16.msra.mxu1 %v1517_v59  ;;  %1336 = vmatprep.subr.bf16.mxu0 %v1518_v60 }
  0x6e   :  { %1358 = vmatprep.subr.bf16.mxu1 %v1519_v61 }
  0x70   :  { %1337 = vmatpush3.bf16.msra.mxu0 %v1520_v62 }
  0x71   :  { %1359 = vmatpush3.bf16.msra.mxu1 %v1521_v63  ;;  %1338 = vmatprep.subr.bf16.mxu0 %v1522_v0 }
  0x72   :  { %1360 = vmatprep.subr.bf16.mxu1 %v1523_v1 }
  0x74   :  { %1339 = vmatpush3.bf16.msra.mxu0 %v1524_v2 }
  0x75   :  { %1361 = vmatpush3.bf16.msra.mxu1 %v1525_v3  ;;  %1340 = vmatprep.subr.bf16.mxu0 %v1526_v4 }
  0x76   :  { %1362 = vmatprep.subr.bf16.mxu1 %v1527_v5 }
  0x78   :  { %1341 = vmatpush3.bf16.msra.mxu0 %v1528_v6 }
  0x79   :  { %1363 = vmatpush3.bf16.msra.mxu1 %v1529_v7  ;;  %1342 = vmatprep.subr.bf16.mxu0 %v1530_v8 }
  0x7a   :  { %1364 = vmatprep.subr.bf16.mxu1 %v1531_v9 }
  0x7c   :  { %1343 = vmatpush3.bf16.msra.mxu0 %v1532_v10  ;;  %v1547_v10 = vld [vmem:[#allocation8 + $0x10] sm:$0xff]  }
  0x7d   :  { %1365 = vmatpush3.bf16.msra.mxu1 %v1533_v11  ;;  %1399 = vmatprep.subr.bf16.mxu0 %v1694_v25  ;;  %v1548_v11 = vld [vmem:[#allocation8 + $0x8] sm:$0xff]  }
  0x7e   :  { %1419 = vmatprep.subr.bf16.mxu1 %v1694_v25 }
  0x7f   :  { %760 = vmatmul.mubr.bf16.vlgmr.msra.gmra.mxu0 %v122_v21 }
  0x80   :  { %801 = vmatmul.mubr.bf16.vlgmr.msra.gmra.mxu1 %v124_v23  ;;  %1400 = vmatpush3.bf16.msra.mxu0 %v1534_v24 }
  0x81   :  { %1401 = vmatprep.subr.bf16.mxu0 %v1694_v25  ;;  %1415 = vmatprep.mubr.msk.bf16.mxu0 %vm1695_vm0, %v1694_v25 }
  0x82   :  { %1435 = vmatprep.mubr.msk.bf16.mxu1 %vm1695_vm0, %v1694_v25  ;;  %1420 = vmatpush3.bf16.msra.mxu1 %v1542_v33 }
  0x83   :  { %1421 = vmatprep.subr.bf16.mxu1 %v1694_v25 }
  0x84   :  { %1402 = vmatpush3.bf16.msra.mxu0 %v1535_v26 }
  0x85   :  { %1403 = vmatprep.subr.bf16.mxu0 %v1694_v25 }
  0x86   :  { %1422 = vmatpush3.bf16.msra.mxu1 %v1543_v34 }
  0x87   :  { %1423 = vmatprep.subr.bf16.mxu1 %v1694_v25 }
  0x88   :  { %1404 = vmatpush3.bf16.msra.mxu0 %v1536_v27 }
  0x89   :  { %1405 = vmatprep.subr.bf16.mxu0 %v1694_v25 }
  0x8a   :  { %1424 = vmatpush3.bf16.msra.mxu1 %v1544_v35 }
  0x8b   :  { %1425 = vmatprep.subr.bf16.mxu1 %v1694_v25 }
  0x8c   :  { %1406 = vmatpush3.bf16.msra.mxu0 %v1537_v28 }
  0x8d   :  { %1407 = vmatprep.subr.bf16.mxu0 %v1694_v25 }
  0x8e   :  { %1426 = vmatpush3.bf16.msra.mxu1 %v1545_v36 }
  0x8f   :  { %1427 = vmatprep.subr.bf16.mxu1 %v1694_v25 }
  0x90   :  { %1408 = vmatpush3.bf16.msra.mxu0 %v1538_v29  ;;  %v1555_v29 = vld [vmem:[#allocation10 + $0x10] sm:$0xff]  }
  0x91   :  { %1409 = vmatprep.subr.bf16.mxu0 %v1694_v25 }
  0x92   :  { %1428 = vmatpush3.bf16.msra.mxu1 %v1546_v37 }
  0x93   :  { %1429 = vmatprep.subr.bf16.mxu1 %v1694_v25 }
  0x94   :  { %1410 = vmatpush3.bf16.msra.mxu0 %v1539_v30  ;;  %v1556_v30 = vld [vmem:[#allocation10 + $0x8] sm:$0xff]  }
  0x95   :  { %1411 = vmatprep.subr.bf16.mxu0 %v1694_v25 }
  0x96   :  { %1430 = vmatpush3.bf16.msra.mxu1 %v1547_v10 }
  0x97   :  { %1431 = vmatprep.subr.bf16.mxu1 %v1694_v25 }
  0x98   :  { %1412 = vmatpush3.bf16.msra.mxu0 %v1540_v31  ;;  %v1557_v31 = vld [vmem:[#allocation10] sm:$0xff]  }
  0x99   :  { %1413 = vmatprep.subr.bf16.mxu0 %v1694_v25 }
  0x9a   :  { %1432 = vmatpush3.bf16.msra.mxu1 %v1548_v11 }
  0x9b   :  { %1433 = vmatprep.subr.bf16.mxu1 %v1694_v25 }
  0x9c   :  { %1414 = vmatpush3.bf16.msra.mxu0 %v1541_v32  ;;  %v1257_v32 = vld [vmem:[%s1829_s6] ss:$0 sm:$0xff]  ;;  %s1658_s6 = scalar_lea.vmem %s1170_s20, 128 }
  0x9d   :  { %1439 = vmatprep.subr.bf16.mxu0 %v1694_v25  ;;  %p1659_p11 = scmp.ne.s32.totalorder %s1170_s20, %s1658_s6  ;;  %p1664_p13 = scmp.lt.s32.totalorder %s1658_s6, %s1658_s6 }
  0x9e   :  { %1434 = vmatpush3.bf16.msra.mxu1 %v1549_v12 }
  0x9f   :  { %p1665_p0 = por %p1664_p13, %p1663_p12 }
  0xa1   :  { %p1666_p1 = pnand %p1665_p0, %p1659_p11 }
 0x11f   :  { %v1300_v38 = vpop.f32.mrf.mxu0 }
 0x120   :  { %v1322_v39 = vpop.f32.mrf.mxu1 }
 0x121   :  { %v1301_v40 = vpop.f32.mrf.mxu0 }
 0x122   :  { %v1323_v41 = vpop.f32.mrf.mxu1  ;;  %v1302_v43 = vadd.f32 %v1301_v40, %v1300_v38 }
 0x123   :  { %v1303_v42 = vpop.f32.mrf.mxu0  ;;  %v1324_v48 = vadd.f32 %v1323_v41, %v1322_v39 }
 0x124   :  { %v1325_v44 = vpop.f32.mrf.mxu1  ;;  %v680_v47 = vadd.f32 %v1302_v43, %v1183_v45 }
 0x125   :  { %v1304_v46 = vpop.f32.mrf.mxu0 }
 0x126   :  { %v1305_v49 = vadd.f32 %v1304_v46, %v1303_v42  ;;  %v1326_v50 = vpop.f32.mrf.mxu1  ;;  %v721_v54 = vadd.f32 %v1324_v48, %v680_v47 }
 0x127   :  { %v1327_v59 = vadd.f32 %v1326_v50, %v1325_v44 }
 0x128   :  { %v683_v55 = vadd.f32 %v1305_v49, %v1183_v45 }
 0x12a   :  { %v724_v63 = vadd.f32 %v1327_v59, %v683_v55 }
 0x13f   :  { %v1344_v51 = vpop.f32.mrf.mxu0 }
 0x140   :  { %v1366_v52 = vpop.f32.mrf.mxu1 }
 0x141   :  { %v1345_v53 = vpop.f32.mrf.mxu0 }
 0x142   :  { %v1346_v56 = vadd.f32 %v1345_v53, %v1344_v51  ;;  %v1367_v57 = vpop.f32.mrf.mxu1 }
 0x143   :  { %v1347_v58 = vpop.f32.mrf.mxu0  ;;  %v1368_v0 = vadd.f32 %v1367_v57, %v1366_v52 }
 0x144   :  { %v762_v60 = vadd.f32 %v1346_v56, %v721_v54  ;;  %v1369_v61 = vpop.f32.mrf.mxu1 }
 0x145   :  { %v1348_v62 = vpop.f32.mrf.mxu0 }
 0x146   :  { %v1349_v1 = vadd.f32 %v1348_v62, %v1347_v58  ;;  %v1370_v2 = vpop.f32.mrf.mxu1  ;;  %v803_v3 = vadd.f32 %v1368_v0, %v762_v60 }
 0x147   :  { %v1371_v5 = vadd.f32 %v1370_v2, %v1369_v61 }
 0x148   :  { %v765_v4 = vadd.f32 %v1349_v1, %v724_v63  ;;  %v809_v7 = vmax.f32 %v803_v3, 0.0 }
 0x14a   :  { %v806_v6 = vadd.f32 %v1371_v5, %v765_v4 }
 0x14c   :  { %v810_v8 = vmax.f32 %v806_v6, 0.0 }
 0x14e   :  { %v811_v9 = vpack.c.bf16 %v810_v8, %v809_v7 }
 0x150   :  { %1416 = vmatmul.mubr.bf16.vlgmr.msra.gmra.mxu0 %v811_v9 }
 0x151   :  { %1455 = vmatprep.mubr.msk.bf16.mxu0 %vm1695_vm0, %v1694_v25  ;;  %1440 = vmatpush3.bf16.msra.mxu0 %v1550_v13 }
 0x152   :  { %1441 = vmatprep.subr.bf16.mxu0 %v1694_v25 }
 0x155   :  { %1442 = vmatpush3.bf16.msra.mxu0 %v1551_v14 }
 0x156   :  { %1443 = vmatprep.subr.bf16.mxu0 %v1694_v25 }
 0x159   :  { %1444 = vmatpush3.bf16.msra.mxu0 %v1552_v15 }
 0x15a   :  { %1445 = vmatprep.subr.bf16.mxu0 %v1694_v25 }
 0x15d   :  { %1446 = vmatpush3.bf16.msra.mxu0 %v1553_v16 }
 0x15e   :  { %1447 = vmatprep.subr.bf16.mxu0 %v1694_v25 }
 0x161   :  { %1448 = vmatpush3.bf16.msra.mxu0 %v1554_v17 }
 0x162   :  { %1449 = vmatprep.subr.bf16.mxu0 %v1694_v25 }
 0x165   :  { %1450 = vmatpush3.bf16.msra.mxu0 %v1555_v29 }
 0x166   :  { %1451 = vmatprep.subr.bf16.mxu0 %v1694_v25 }
 0x169   :  { %1452 = vmatpush3.bf16.msra.mxu0 %v1556_v30 }
 0x16a   :  { %1453 = vmatprep.subr.bf16.mxu0 %v1694_v25  ;;  %v1266_v25 = vld [vmem:[%s1831_s8] ss:$0 sm:$0xff] }
 0x16d   :  { %1454 = vmatpush3.bf16.msra.mxu0 %v1557_v31 }
 0x210   :  { %v917_v19 = vpop.f32.mrf.mxu0 }
 0x211   :  { %v918_v21 = vadd.f32 %v1248_v18, %v917_v19 }
 0x212   :  { %v1417_v20 = vpop.f32.mrf.mxu0 }
 0x213   :  { %v924_v26 = vmax.f32 %v918_v21, 0.0 }
 0x214   :  { %v920_v22 = vpop.f32.mrf.mxu0 }
 0x215   :  { %v921_v23 = vadd.f32 %v1248_v18, %v920_v22 }
 0x216   :  { %v1418_v24 = vpop.f32.mrf.mxu0 }
 0x217   :  { %v925_v27 = vmax.f32 %v921_v23, 0.0 }
 0x219   :  { %v926_v28 = vpack.c.bf16 %v925_v27, %v924_v26 }
 0x21b   :  { %1436 = vmatmul.mubr.bf16.vlgmr.msra.gmra.mxu1 %v926_v28 }
 0x2db   :  { %v1032_v33 = vpop.f32.mrf.mxu1 }
 0x2dc   :  { %v1033_v35 = vadd.f32 %v1257_v32, %v1032_v33 }
 0x2dd   :  { %v1437_v34 = vpop.f32.mrf.mxu1 }
 0x2de   :  { %v1039_v39 = vmax.f32 %v1033_v35, 0.0 }
 0x2df   :  { %v1035_v36 = vpop.f32.mrf.mxu1 }
 0x2e0   :  { %v1036_v37 = vadd.f32 %v1257_v32, %v1035_v36 }
 0x2e1   :  { %v1438_v38 = vpop.f32.mrf.mxu1 }
 0x2e2   :  { %v1040_v40 = vmax.f32 %v1036_v37, 0.0 }
 0x2e4   :  { %v1041_v41 = vpack.c.bf16 %v1040_v40, %v1039_v39 }
 0x2e6   :  { %1456 = vmatmul.mubr.bf16.vlgmr.msra.gmra.mxu0 %v1041_v41 }
 0x3a6   :  { %v1147_v42 = vpop.f32.mrf.mxu0 }
 0x3a7   :  { %v1148_v45 = vadd.f32 %v1266_v25, %v1147_v42 }
 0x3a8   :  { %v1457_v43 = vpop.f32.mrf.mxu0 }
 0x3aa   :  { %v1150_v44 = vpop.f32.mrf.mxu0 }
 0x3ab   :  { %v1151_v46 = vadd.f32 %v1266_v25, %v1150_v44 }
 0x3ac   :  { %v1458_v47 = vpop.f32.mrf.mxu0 }
 0x3ad   :  { %v1282_v48 = vpack.c.bf16 %v1151_v46, %v1148_v45 }
 0x3af   :  { %1283 = vst [vmem:[#allocation11] sm:$0xff] %v1282_v48  }
 0x3b0   :  { %1669 = shalt.err (!%p1666_p1)
}
 0x3b1   :  { %1175 = dma.vmem_to_hbm [thread:$0]  %s1170_s20, 128, %s1832_s9, [#allocation4], %s1687_s12, %s1687_s12, %s1688_s13  }
 0x3b2   :  { %1684 = dma.done.wait [#allocation4], 128  }
 0x3b3   :  { %1685 = vsyncadd [#allocation4], 4294967168 }
 0x3b4   :  { %1179 = vsyncpa [#allocation3], 1 }
 0x3b5   :  { %1180 = vsyncpa [#allocation6], 1 }
 0x3b6   :  { %1181 = vsyncpa [#allocation9], 1 }
 0x3b7   :  { %1182 = vsyncpa [#allocation4], 1 }

</bundles_post_ra>
